<compile_context>
chip_gen: v7x
topology: tpu7x:2x2x1
jax: 0.10.0
libtpu: 0.0.40
codegen_flags: <defaults>
</compile_context>

<pallas_src>
import jax
import jax.numpy as jnp
import numpy as np
from jax.experimental import pallas as pl
from jax.experimental.pallas import tpu as pltpu

TILE_LANES = 128
MAX_BLOCK_ROWS = 2048  # 2048 x 128 x 4B = 1 MiB per input block


def _round_up(x, m):
    return ((x + m - 1) // m) * m


def _wawl_kernel(inv_gamma_ref, dx_ref, dy_ref, w_ref, out_ref):
    """Per-tnet closed-form WA wirelength + weighted sublane-grouped partial sum."""
    half_inv_gamma = inv_gamma_ref[0] * jnp.float32(0.5)

    dx = dx_ref[...]
    dy = dy_ref[...]
    w = w_ref[...]

    # 2-pin WA wirelength closed form: d * tanh(d / (2*gamma)).
    wl = dx * jnp.tanh(dx * half_inv_gamma) + dy * jnp.tanh(dy * half_inv_gamma)
    contrib = w * wl  # (block_rows, 128)

    # Reduce the block's rows down to an (8, 128) partial (pure VPU adds; the
    # reshape splits the sublane axis along existing (8,128) vreg tiles).
    block_rows = contrib.shape[0]
    out_ref[...] = jnp.sum(contrib.reshape(block_rows // 8, 8, TILE_LANES), axis=0)


@jax.jit
def timing_net_wirelength_forward(pos, flat_tnetpin, tnet_weights, inv_gamma):
    """JAX wrapper mirroring TimingNetWirelengthMergedFunction.forward (output[0]).

    pos:           (2*num_pins,) float32, x coords then y coords.
    flat_tnetpin:  (2*num_tnets,) int32, pin pair per timing net.
    tnet_weights:  (num_tnets,) float32.
    inv_gamma:     scalar float32 (= 1/gamma).
    Returns a scalar float32 (the weighted total smoothed wirelength).
    """
    num_pins = pos.shape[0] // 2
    num_tnets = tnet_weights.shape[0]

    x = pos[:num_pins]
    y = pos[num_pins:]
    tp = flat_tnetpin.reshape(num_tnets, 2)

    # Gather + pairwise difference (glue; fuses into one XLA gather pass).
    dx = x[tp[:, 0]] - x[tp[:, 1]]
    dy = y[tp[:, 0]] - y[tp[:, 1]]
    w = tnet_weights.astype(jnp.float32)

    # Tiling: lay tnets along 128-wide lanes, pick a block-row count that keeps
    # padding small while never exceeding MAX_BLOCK_ROWS.
    rows_needed = max(1, -(-num_tnets // TILE_LANES))
    num_tiles = -(-rows_needed // MAX_BLOCK_ROWS)
    block_rows = _round_up(-(-rows_needed // num_tiles), 8)
    total_rows = num_tiles * block_rows
    pad = total_rows * TILE_LANES - num_tnets

    def _prep(v):
        v = jnp.pad(v.astype(jnp.float32), (0, pad))  # padded nets: d=0, w=0 -> 0
        return v.reshape(total_rows, TILE_LANES)

    dx2, dy2, w2 = _prep(dx), _prep(dy), _prep(w)

    inv_gamma_arr = jnp.asarray(inv_gamma, jnp.float32).reshape(1)

    tile_spec = pl.BlockSpec((block_rows, TILE_LANES), lambda i: (i, 0))

    partials = pl.pallas_call(
        _wawl_kernel,
        out_shape=jax.ShapeDtypeStruct((num_tiles * 8, TILE_LANES), jnp.float32),
        grid=(num_tiles,),
        in_specs=[
            pl.BlockSpec(memory_space=pltpu.MemorySpace.SMEM),  # inv_gamma
            tile_spec,  # dx
            tile_spec,  # dy
            tile_spec,  # tnet weights
        ],
        out_specs=pl.BlockSpec((8, TILE_LANES), lambda i: (i, 0)),
        compiler_params=pltpu.CompilerParams(
            dimension_semantics=("parallel",)  # independent per-tile partials
        ),
    )(inv_gamma_arr, dx2, dy2, w2)

    # Tiny final reduction of the per-tile lane partials.
    return jnp.sum(partials)


def timing_net_wirelength_ref(pos, flat_tnetpin, tnet_weights, inv_gamma):
    """Pure-JAX reference using the original exp-ratio WA formulation."""

    def _wa_pair(a, b):
        mx = jnp.maximum(a, b)
        mn = jnp.minimum(a, b)
        ep_a = jnp.exp((a - mx) * inv_gamma)
        ep_b = jnp.exp((b - mx) * inv_gamma)
        en_a = jnp.exp((mn - a) * inv_gamma)
        en_b = jnp.exp((mn - b) * inv_gamma)
        pos_term = (a * ep_a + b * ep_b) / (ep_a + ep_b)
        neg_term = (a * en_a + b * en_b) / (en_a + en_b)
        return pos_term - neg_term

    num_pins = pos.shape[0] // 2
    tp = flat_tnetpin.reshape(-1, 2)
    x = pos[:num_pins]
    y = pos[num_pins:]
    wl = _wa_pair(x[tp[:, 0]], x[tp[:, 1]]) + _wa_pair(y[tp[:, 0]], y[tp[:, 1]])
    return jnp.sum(tnet_weights * wl)


if __name__ == "__main__":
    key = jax.random.PRNGKey(0)
    k_pos, k_pin, k_w = jax.random.split(key, 3)

    # Small, deterministic problem consistent with the module's forward.
    num_pins = 64
    num_tnets = 200
    xl, yl, xh, yh = 0.0, 0.0, 16.0, 16.0  # accepted by the module, not needed for value
    gamma = 0.5
    inv_gamma = jnp.float32(1.0 / gamma)

    xs = jax.random.uniform(k_pos, (num_pins,), jnp.float32, xl, xh)
    ys = jax.random.uniform(jax.random.fold_in(k_pos, 1), (num_pins,), jnp.float32, yl, yh)
    pos = jnp.concatenate([xs, ys])  # (2*num_pins,): x coords then y coords

    flat_tnetpin = jax.random.randint(k_pin, (2 * num_tnets,), 0, num_pins, jnp.int32)
    tnet_weights = jax.random.uniform(k_w, (num_tnets,), jnp.float32, 0.1, 2.0)

    # pin_mask / num_threads / deterministic_flag only affect backward / scheduling.
    # TODO(synk): backward pass (grad_intermediate + pin_mask fill) is not implemented.

    out = timing_net_wirelength_forward(pos, flat_tnetpin, tnet_weights, inv_gamma)
    out = jax.block_until_ready(out)

    ref = jax.block_until_ready(
        timing_net_wirelength_ref(pos, flat_tnetpin, tnet_weights, inv_gamma)
    )
    np.testing.assert_allclose(np.asarray(out), np.asarray(ref), rtol=1e-5, atol=1e-4)

    print("KERNEL_OK")
</pallas_src>

<mosaic_0001>
module attributes {stable_mosaic.version = 11 : i64} {
  func.func @_wawl_kernel(%arg0: i32, %arg1: memref<1xf32, #tpu.memory_space<smem>>, %arg2: memref<8x128xf32, #tpu.memory_space<vmem>>, %arg3: memref<8x128xf32, #tpu.memory_space<vmem>>, %arg4: memref<8x128xf32, #tpu.memory_space<vmem>>, %arg5: memref<8x128xf32, #tpu.memory_space<vmem>>) attributes {dimension_semantics = [#tpu.dimension_semantics<parallel>], iteration_bounds = array<i64: 1>, scalar_prefetch = 0 : i64, scratch_operands = 0 : i64, tpu.core_type = #tpu.core_type<tc>, window_params = [{transform_indices = @transform_0, window_bounds = array<i64: 1>}, {transform_indices = @transform_1, window_bounds = array<i64: 8, 128>}, {transform_indices = @transform_2, window_bounds = array<i64: 8, 128>}, {transform_indices = @transform_3, window_bounds = array<i64: 8, 128>}, {transform_indices = @transform_4, window_bounds = array<i64: 8, 128>}]} {
    %c0 = arith.constant 0 : index
    %0 = memref.load %arg1[%c0] : memref<1xf32, #tpu.memory_space<smem>>
    %cst = arith.constant 5.000000e-01 : f32
    %1 = arith.mulf %0, %cst : f32
    %c0_0 = arith.constant 0 : index
    %c0_1 = arith.constant 0 : index
    %2 = vector.load %arg2[%c0_0, %c0_1] : memref<8x128xf32, #tpu.memory_space<vmem>>, vector<8x128xf32>
    %c0_2 = arith.constant 0 : index
    %c0_3 = arith.constant 0 : index
    %3 = vector.load %arg3[%c0_2, %c0_3] : memref<8x128xf32, #tpu.memory_space<vmem>>, vector<8x128xf32>
    %c0_4 = arith.constant 0 : index
    %c0_5 = arith.constant 0 : index
    %4 = vector.load %arg4[%c0_4, %c0_5] : memref<8x128xf32, #tpu.memory_space<vmem>>, vector<8x128xf32>
    %5 = vector.broadcast %1 : f32 to vector<8x128xf32>
    %6 = arith.mulf %2, %5 : vector<8x128xf32>
    %7 = math.tanh %6 : vector<8x128xf32>
    %8 = arith.mulf %2, %7 : vector<8x128xf32>
    %9 = vector.broadcast %1 : f32 to vector<8x128xf32>
    %10 = arith.mulf %3, %9 : vector<8x128xf32>
    %11 = math.tanh %10 : vector<8x128xf32>
    %12 = arith.mulf %3, %11 : vector<8x128xf32>
    %13 = arith.addf %8, %12 : vector<8x128xf32>
    %14 = arith.mulf %4, %13 : vector<8x128xf32>
    %15 = vector.shape_cast %14 : vector<8x128xf32> to vector<1x8x128xf32>
    %cst_6 = arith.constant dense<0.000000e+00> : vector<8x128xf32>
    %16 = vector.multi_reduction <add>, %15, %cst_6 [0] : vector<1x8x128xf32> to vector<8x128xf32>
    %c0_7 = arith.constant 0 : index
    %c0_8 = arith.constant 0 : index
    %17 = vector.load %arg5[%c0_7, %c0_8] : memref<8x128xf32, #tpu.memory_space<vmem>>, vector<8x128xf32>
    tpu.vector_store %arg5[%c0_7, %c0_8], %16 {strides = array<i32>} : memref<8x128xf32, #tpu.memory_space<vmem>>, vector<8x128xf32>,
    return
  }
  func.func @transform_0(%arg0: i32) -> i32 {
    %c0_i32 = arith.constant 0 : i32
    %c0_i32_0 = arith.constant 0 : i32
    return %c0_i32 : i32
  }
  func.func @transform_1(%arg0: i32) -> (i32, i32) {
    %c0_i32 = arith.constant 0 : i32
    %c0_i32_0 = arith.constant 0 : i32
    return %arg0, %c0_i32 : i32, i32
  }
  func.func @transform_2(%arg0: i32) -> (i32, i32) {
    %c0_i32 = arith.constant 0 : i32
    %c0_i32_0 = arith.constant 0 : i32
    return %arg0, %c0_i32 : i32, i32
  }
  func.func @transform_3(%arg0: i32) -> (i32, i32) {
    %c0_i32 = arith.constant 0 : i32
    %c0_i32_0 = arith.constant 0 : i32
    return %arg0, %c0_i32 : i32, i32
  }
  func.func @transform_4(%arg0: i32) -> (i32, i32) {
    %c0_i32 = arith.constant 0 : i32
    %c0_i32_0 = arith.constant 0 : i32
    return %arg0, %c0_i32 : i32, i32
  }
}

</mosaic_0001>

<bundles_post_ra>
// kernel: sub.3
= control target key start
LH: loop header
LB: loop body
LE: loop exit
PB: predicated region body
PF: predicated region fallthrough
CT: control target
= control target key end

     0   :  { %s34_s0 = inlined_call_operand.vmem [shape: f32[200], index: 0, kind: input, shape index: {}]   ;;  %s35_s1 = inlined_call_operand.vmem [shape: f32[200], index: 1, kind: input, shape index: {}]   ;;  %s36_s2 = inlined_call_operand.vmem [shape: f32[200], index: 2, kind: output, shape index: {}]  }
   0x1   :  { %v3_v0 = vld [vmem:[%s34_s0] sm:$0x3] }
   0x2   :  { %v4_v1 = vld [vmem:[%s35_s1] sm:$0x3] }
   0x3   :  { %v7_v2 = vsub.f32 %v3_v0, %v4_v1 }
   0x5   :  { %9 = vst [vmem:[%s36_s2] sm:$0x3] %v7_v2 }

// kernel: timing_net_wirelength_forward.1
= control target key start
LH: loop header
LB: loop body
LE: loop exit
PB: predicated region body
PF: predicated region fallthrough
CT: control target
= control target key end

     0   :  { %s82_s0 = inlined_call_operand.<no memory space> [shape: f32[1], index: 0, kind: input, shape index: {}]   ;;  %s83_s1 = inlined_call_operand.vmem [shape: f32[8,128], index: 1, kind: input, shape index: {}]   ;;  %s84_s2 = inlined_call_operand.vmem [shape: f32[8,128], index: 2, kind: input, shape index: {}]   ;;  %s85_s3 = inlined_call_operand.vmem [shape: f32[8,128], index: 3, kind: input, shape index: {}]   ;;  %s86_s4 = inlined_call_operand.vmem [shape: f32[8,128], index: 4, kind: output, shape index: {}]  }
   0x1   :  { %s19_s17 = smul.f32 0.5, %s82_s0  ;;  %v20_v0 = vld [vmem:[%s83_s1] sm:$0xff] }
   0x2   :  { %v21_v1 = vld [vmem:[%s84_s2] sm:$0xff] }
   0x3   :  { %v23_v2 = vstv %s19_s17  ;;  %v22_v9 = vld [vmem:[%s85_s3] sm:$0xff] }
   0x4   :  { %v24_v3 = vmul.f32 %v23_v2, %v20_v0  ;;  %v27_v4 = vmul.f32 %v23_v2, %v21_v1 }
   0x6   :  { %38 = vtanh.f32 %v24_v3 }
   0x7   :  { %40 = vtanh.f32 %v27_v4 }
  0x10   :  { %v39_v5 = vpop.eup %38 }
  0x11   :  { %v41_v6 = vpop.eup %40  ;;  %v26_v7 = vmul.f32 %v39_v5, %v20_v0 }
  0x12   :  { %v29_v8 = vmul.f32 %v41_v6, %v21_v1 }
  0x14   :  { %v30_v10 = vadd.f32 %v29_v8, %v26_v7 }
  0x16   :  { %v31_v11 = vmul.f32 %v30_v10, %v22_v9 }
  0x18   :  { %33 = vst [vmem:[%s86_s4] sm:$0xff] %v31_v11 }

</bundles_post_ra>
